<compile_context>
chip_gen: v7x
topology: tpu7x:2x2x1
jax: 0.10.0
libtpu: 0.0.40
codegen_flags: <defaults>
</compile_context>

<pallas_src>
import functools
import math

import jax
import jax.numpy as jnp
from jax.experimental import pallas as pl
from jax.experimental.pallas import tpu as pltpu


def _layernorm(v, g, b, eps=1e-5):
    mu = jnp.mean(v, axis=-1, keepdims=True)
    var = jnp.mean((v - mu) ** 2, axis=-1, keepdims=True)
    return (v - mu) * jax.lax.rsqrt(var + eps) * g + b


def transformer_block_kernel(
    x_ref, bias_ref,
    ln1_g_ref, ln1_b_ref, wqkv_ref, wo_ref, bo_ref,
    ln2_g_ref, ln2_b_ref, w1_ref, b1_ref, w2_ref, b2_ref,
    o_ref,
    *, heads, kv_chunk, ffn_chunk,
):
    Nb, S, E = x_ref.shape
    dh = E // heads
    M = Nb * S
    B = heads * Nb
    scale = 1.0 / math.sqrt(dh)

    x = x_ref[...].reshape(M, E)                     # (M, E) f32, flattened rows for MXU
    bias = bias_ref[...].astype(jnp.float32)         # (Nb, S, S) additive mask bias

    # ---- pre-norm multi-head self-attention ----------------------------------------
    xn = _layernorm(x, ln1_g_ref[...], ln1_b_ref[...]).astype(jnp.bfloat16)

    # One fused full-width QKV projection (MXU output width = 3E).
    qkv = jnp.dot(xn, wqkv_ref[...], preferred_element_type=jnp.float32)   # (M, 3E) f32

    def split_heads(base):
        # Cheap lane slices + leading-dim stack; heads*batch become the einsum batch dim.
        hs = [qkv[:, base + h * dh: base + (h + 1) * dh] for h in range(heads)]
        return jnp.stack(hs, axis=0).reshape(B, S, dh).astype(jnp.bfloat16)

    q = split_heads(0)            # (H*Nb, S, dh) bf16
    k = split_heads(E)
    v = split_heads(2 * E)

    # Flash-style online softmax over KV chunks: attention temporaries bounded to
    # (H*Nb, S, kv_chunk) instead of the full (H*Nb, S, S) scores matrix.
    m_run = jnp.full((B, S, 1), -jnp.inf, jnp.float32)
    l_run = jnp.zeros((B, S, 1), jnp.float32)
    acc = jnp.zeros((B, S, dh), jnp.float32)
    for t in range(S // kv_chunk):
        c0 = t * kv_chunk
        k_t = k[:, c0:c0 + kv_chunk, :]
        v_t = v[:, c0:c0 + kv_chunk, :]
        s = jnp.einsum("bqd,bkd->bqk", q, k_t,
                       preferred_element_type=jnp.float32) * scale
        s = (s.reshape(heads, Nb, S, kv_chunk)
             + bias[None, :, :, c0:c0 + kv_chunk]).reshape(B, S, kv_chunk)
        m_new = jnp.maximum(m_run, jnp.max(s, axis=-1, keepdims=True))
        alpha = jnp.exp(m_run - m_new)
        p = jnp.exp(s - m_new)
        l_run = alpha * l_run + jnp.sum(p, axis=-1, keepdims=True)
        acc = alpha * acc + jnp.einsum("bqk,bkd->bqd", p.astype(jnp.bfloat16), v_t,
                                       preferred_element_type=jnp.float32)
        m_run = m_new
    # approx reciprocal (EUP slot); fine for inference, use approx=False for training.
    ctx = acc * pl.reciprocal(l_run, approx=True)    # (H*Nb, S, dh) f32

    # Single full-depth output projection: concat heads back to (M, E) (cheap lane
    # copy), then one MXU matmul with K = E. Matches concat(heads) @ Wo semantics.
    ctx = ctx.reshape(heads, M, dh)
    ctx_cat = jnp.concatenate([ctx[h] for h in range(heads)],
                              axis=-1).astype(jnp.bfloat16)            # (M, E) bf16
    attn = jnp.dot(ctx_cat, wo_ref[...],
                   preferred_element_type=jnp.float32) + bo_ref[...]

    x1 = x + attn                                    # dropout == identity (eval)

    # ---- pre-norm feed-forward, streamed over F chunks ------------------------------
    xn2 = _layernorm(x1, ln2_g_ref[...], ln2_b_ref[...]).astype(jnp.bfloat16)
    F = w1_ref.shape[1]
    ffn = jnp.zeros((M, E), jnp.float32)
    for t in range(F // ffn_chunk):
        f0 = t * ffn_chunk
        h1 = jnp.dot(xn2, w1_ref[:, f0:f0 + ffn_chunk],
                     preferred_element_type=jnp.float32)
        h1 = jnp.maximum(h1 + b1_ref[:, f0:f0 + ffn_chunk], 0.0).astype(jnp.bfloat16)
        ffn = ffn + jnp.dot(h1, w2_ref[f0:f0 + ffn_chunk, :],
                            preferred_element_type=jnp.float32)
    ffn = ffn + b2_ref[...]

    o_ref[...] = (x1 + ffn).reshape(Nb, S, E)


def _largest_divisor_leq(n, cap):
    for d in range(min(n, cap), 0, -1):
        if n % d == 0:
            return d
    return n


def _pick_block_batch(N, S, row_target=1024):
    """Largest batch block keeping Nb*S rows MXU-friendly while leaving >= 2 grid
    steps when N allows (v7x has two TensorCores to feed)."""
    best = 1
    for d in range(1, N + 1):
        if N % d:
            continue
        if d * S > max(S, row_target):
            continue
        if N >= 2 and N // d < 2:
            continue
        best = d
    return best


def _vmem_limit_bytes(Nb, S, E, F, heads, weights, kv_chunk, ffn_chunk):
    M, B = Nb * S, heads * Nb
    w_bytes = 2 * sum(int(a.size) * a.dtype.itemsize for a in weights)   # double-buffered
    io_bytes = 2 * (2 * M * E * 4 + Nb * S * S * 2)                      # x / out / bias
    act_bytes = (8 * M * E * 4 + 4 * M * E * 2                           # row temporaries
                 + 3 * B * S * kv_chunk * 4                              # score chunk
                 + 2 * M * ffn_chunk * 4)                                # ffn hidden chunk
    est = int(1.5 * (w_bytes + io_bytes + act_bytes))
    return min(100 * 1024 * 1024, max(32 * 1024 * 1024, est))


def transformer_block(x, mask_bias, p, *, heads):
    """x: (N, S, E) f32, mask_bias: (N, S, S) bf16 additive bias, p: packed params."""
    N, S, E = x.shape
    F = p["w1"].shape[1]
    assert E % heads == 0
    Nb = _pick_block_batch(N, S)
    kv_chunk = _largest_divisor_leq(S, 512)
    ffn_chunk = _largest_divisor_leq(F, 2048)

    def batched(shape):
        nd = len(shape)
        return pl.BlockSpec(shape, lambda i, _nd=nd: (i,) + (0,) * (_nd - 1))

    def resident(arr):
        # Full-shape block + constant index_map: weights stay resident in VMEM across
        # the (parallel) batch grid axis.
        nd = arr.ndim
        return pl.BlockSpec(arr.shape, lambda i, _nd=nd: (0,) * _nd)

    weights = [p["ln1_g"], p["ln1_b"], p["wqkv"], p["wo"], p["bo"],
               p["ln2_g"], p["ln2_b"], p["w1"], p["b1"], p["w2"], p["b2"]]

    in_specs = ([batched((Nb, S, E)), batched((Nb, S, S))]
                + [resident(w) for w in weights])

    return pl.pallas_call(
        functools.partial(transformer_block_kernel, heads=heads,
                          kv_chunk=kv_chunk, ffn_chunk=ffn_chunk),
        out_shape=jax.ShapeDtypeStruct((N, S, E), jnp.float32),
        grid_spec=pltpu.PrefetchScalarGridSpec(
            num_scalar_prefetch=0,
            grid=(N // Nb,),
            in_specs=in_specs,
            out_specs=batched((Nb, S, E)),
        ),
        compiler_params=pltpu.CompilerParams(
            dimension_semantics=("parallel",),
            vmem_limit_bytes=_vmem_limit_bytes(Nb, S, E, F, heads, weights,
                                               kv_chunk, ffn_chunk)),
    )(x, mask_bias, *weights)


def init_params(key, *, vocab, embed, heads, forward_expansion, max_length, num_layers):
    E, F = embed, forward_expansion * embed
    keys = jax.random.split(key, 2 + num_layers)

    def normal(k, shape, scale=0.02):
        return (scale * jax.random.normal(k, shape)).astype(jnp.float32)

    params = {
        "heads": heads,
        "word_emb": normal(keys[0], (vocab, E)),
        "pos_emb": normal(keys[1], (max_length, E)),
        "layers": [],
    }
    for l in range(num_layers):
        lk = jax.random.split(keys[2 + l], 8)
        params["layers"].append({
            "ln1_g": jnp.ones((1, E), jnp.float32),
            "ln1_b": jnp.zeros((1, E), jnp.float32),
            "wq": normal(lk[0], (E, E)),
            "wk": normal(lk[1], (E, E)),
            "wv": normal(lk[2], (E, E)),
            "wo": normal(lk[3], (E, E)),
            "bo": jnp.zeros((1, E), jnp.float32),
            "ln2_g": jnp.ones((1, E), jnp.float32),
            "ln2_b": jnp.zeros((1, E), jnp.float32),
            "w1": normal(lk[4], (E, F)),
            "b1": jnp.zeros((1, F), jnp.float32),
            "w2": normal(lk[5], (F, E)),
            "b2": jnp.zeros((1, E), jnp.float32),
        })
    return params


def pack_params(params):
    """One-time repack (NOT per forward) of f32 weights into the kernel layout:
    fused (E, 3E) bf16 QKV, bf16 Wo/W1/W2; LayerNorm gains and biases stay f32."""
    packed = {"heads": params["heads"],
              "word_emb": params["word_emb"],
              "pos_emb": params["pos_emb"],
              "layers": []}
    for lp in params["layers"]:
        packed["layers"].append({
            "ln1_g": lp["ln1_g"], "ln1_b": lp["ln1_b"],
            "wqkv": jnp.concatenate([lp["wq"], lp["wk"], lp["wv"]],
                                    axis=1).astype(jnp.bfloat16),
            "wo": lp["wo"].astype(jnp.bfloat16),
            "bo": lp["bo"],
            "ln2_g": lp["ln2_g"], "ln2_b": lp["ln2_b"],
            "w1": lp["w1"].astype(jnp.bfloat16), "b1": lp["b1"],
            "w2": lp["w2"].astype(jnp.bfloat16), "b2": lp["b2"],
        })
    return packed


def gpt_decoder_forward(x_tokens, mask, packed):
    """x_tokens: (N, S) float (rounded to token ids), mask: (N, S, S); packed params."""
    N, S = x_tokens.shape
    ids = jnp.round(x_tokens).astype(jnp.int32)
    positions = jnp.arange(S, dtype=jnp.int32)
    out = packed["word_emb"][ids] + packed["pos_emb"][positions][None, :, :]
    # Mask folded ONCE per forward into a bf16 additive bias (0 keep / -1e20 masked):
    # half the per-layer mask DMA, no in-kernel compare+select.
    mask_bias = jnp.where(mask == 0, -1e20, 0.0).astype(jnp.bfloat16)
    heads = packed["heads"]
    for lp in packed["layers"]:
        out = transformer_block(out, mask_bias, lp, heads=heads)
    return out


# ---------------- pure-JAX f32 reference (for numerics validation) ----------------
def _block_ref(x, mask, lp, heads):
    E = x.shape[-1]
    dh = E // heads

    def ln(v, g, b, eps=1e-5):
        mu = jnp.mean(v, axis=-1, keepdims=True)
        var = jnp.mean((v - mu) ** 2, axis=-1, keepdims=True)
        return (v - mu) / jnp.sqrt(var + eps) * g + b

    xn = ln(x, lp["ln1_g"], lp["ln1_b"])
    q, k, v = xn @ lp["wq"], xn @ lp["wk"], xn @ lp["wv"]

    def split(t):                       # (N, S, E) -> (N, H, S, dh)
        n, s, _ = t.shape
        return t.reshape(n, s, heads, dh).transpose(0, 2, 1, 3)

    qh, kh, vh = split(q), split(k), split(v)
    s = jnp.einsum("nhqd,nhkd->nhqk", qh, kh) / jnp.sqrt(jnp.float32(dh))
    s = jnp.where(mask[:, None, :, :] == 0, -1e20, s)
    pr = jax.nn.softmax(s, axis=-1)
    ctx = jnp.einsum("nhqk,nhkd->nhqd", pr, vh)
    ctx = ctx.transpose(0, 2, 1, 3).reshape(x.shape)
    x1 = x + ctx @ lp["wo"] + lp["bo"]
    xn2 = ln(x1, lp["ln2_g"], lp["ln2_b"])
    h1 = jax.nn.relu(xn2 @ lp["w1"] + lp["b1"])
    return x1 + h1 @ lp["w2"] + lp["b2"]


def gpt_decoder_forward_ref(x_tokens, mask, params):
    N, S = x_tokens.shape
    ids = jnp.round(x_tokens).astype(jnp.int32)
    positions = jnp.arange(S, dtype=jnp.int32)
    out = params["word_emb"][ids] + params["pos_emb"][positions][None, :, :]
    for lp in params["layers"]:
        out = _block_ref(out, mask, lp, params["heads"])
    return out


if __name__ == "__main__":
    # small config consistent with the module's forward
    trg_vocab_size = 50
    embed_size = 32
    heads = 4
    forward_expansion = 4
    max_length = 16
    num_layers = 2
    N, S = 2, 8

    key = jax.random.PRNGKey(0)
    k_param, k_x = jax.random.split(key)

    params = init_params(
        k_param, vocab=trg_vocab_size, embed=embed_size, heads=heads,
        forward_expansion=forward_expansion, max_length=max_length,
        num_layers=num_layers)
    packed = pack_params(params)     # hoisted: repack once, not per forward call

    # token ids given as floats (the module rounds them), causal mask
    x = jax.random.uniform(k_x, (N, S), minval=0.0, maxval=float(trg_vocab_size - 1))
    mask = jnp.tril(jnp.ones((S, S), jnp.float32))[None, :, :].repeat(N, axis=0)

    out = gpt_decoder_forward(x, mask, packed)
    out = jax.block_until_ready(out)
    assert out.shape == (N, S, embed_size)
    assert jnp.all(jnp.isfinite(out))

    # bf16 matmul inputs + approx reciprocal give ~1e-3-level deviation at these
    # magnitudes; validate against the pure-JAX f32 reference with a loose tolerance.
    ref = gpt_decoder_forward_ref(x, mask, params)
    max_err = float(jnp.max(jnp.abs(out - ref)))
    assert max_err < 2e-2, f"kernel deviates from reference: max_err={max_err}"

    print("KERNEL_OK")
</pallas_src>

<mosaic_0001>
module attributes {stable_mosaic.version = 11 : i64} {
  func.func @transformer_block_kernel(%arg0: i32, %arg1: memref<1x8x32xf32, #tpu.memory_space<vmem>>, %arg2: memref<1x8x8xbf16, #tpu.memory_space<vmem>>, %arg3: memref<1x32xf32, #tpu.memory_space<vmem>>, %arg4: memref<1x32xf32, #tpu.memory_space<vmem>>, %arg5: memref<32x96xbf16, #tpu.memory_space<vmem>>, %arg6: memref<32x32xbf16, #tpu.memory_space<vmem>>, %arg7: memref<1x32xf32, #tpu.memory_space<vmem>>, %arg8: memref<1x32xf32, #tpu.memory_space<vmem>>, %arg9: memref<1x32xf32, #tpu.memory_space<vmem>>, %arg10: memref<32x128xbf16, #tpu.memory_space<vmem>>, %arg11: memref<1x128xf32, #tpu.memory_space<vmem>>, %arg12: memref<128x32xbf16, #tpu.memory_space<vmem>>, %arg13: memref<1x32xf32, #tpu.memory_space<vmem>>, %arg14: memref<1x8x32xf32, #tpu.memory_space<vmem>>) attributes {dimension_semantics = [#tpu.dimension_semantics<parallel>], iteration_bounds = array<i64: 2>, scalar_prefetch = 0 : i64, scratch_operands = 0 : i64, tpu.core_type = #tpu.core_type<tc>, window_params = [{transform_indices = @transform_0, window_bounds = array<i64: 1, 8, 32>}, {transform_indices = @transform_1, window_bounds = array<i64: 1, 8, 8>}, {pipeline_mode = #tpu.pipeline_mode<synchronous>, transform_indices = @transform_2, window_bounds = array<i64: 1, 32>}, {pipeline_mode = #tpu.pipeline_mode<synchronous>, transform_indices = @transform_3, window_bounds = array<i64: 1, 32>}, {pipeline_mode = #tpu.pipeline_mode<synchronous>, transform_indices = @transform_4, window_bounds = array<i64: 32, 96>}, {pipeline_mode = #tpu.pipeline_mode<synchronous>, transform_indices = @transform_5, window_bounds = array<i64: 32, 32>}, {pipeline_mode = #tpu.pipeline_mode<synchronous>, transform_indices = @transform_6, window_bounds = array<i64: 1, 32>}, {pipeline_mode = #tpu.pipeline_mode<synchronous>, transform_indices = @transform_7, window_bounds = array<i64: 1, 32>}, {pipeline_mode = #tpu.pipeline_mode<synchronous>, transform_indices = @transform_8, window_bounds = array<i64: 1, 32>}, {pipeline_mode = #tpu.pipeline_mode<synchronous>, transform_indices = @transform_9, window_bounds = array<i64: 32, 128>}, {pipeline_mode = #tpu.pipeline_mode<synchronous>, transform_indices = @transform_10, window_bounds = array<i64: 1, 128>}, {pipeline_mode = #tpu.pipeline_mode<synchronous>, transform_indices = @transform_11, window_bounds = array<i64: 128, 32>}, {pipeline_mode = #tpu.pipeline_mode<synchronous>, transform_indices = @transform_12, window_bounds = array<i64: 1, 32>}, {transform_indices = @transform_13, window_bounds = array<i64: 1, 8, 32>}]} {
    %c0 = arith.constant 0 : index
    %c0_0 = arith.constant 0 : index
    %c0_1 = arith.constant 0 : index
    %0 = vector.load %arg1[%c0, %c0_0, %c0_1] : memref<1x8x32xf32, #tpu.memory_space<vmem>>, vector<1x8x32xf32>
    %1 = vector.shape_cast %0 : vector<1x8x32xf32> to vector<8x32xf32>
    %c0_2 = arith.constant 0 : index
    %c0_3 = arith.constant 0 : index
    %c0_4 = arith.constant 0 : index
    %2 = vector.load %arg2[%c0_2, %c0_3, %c0_4] : memref<1x8x8xbf16, #tpu.memory_space<vmem>>, vector<1x8x8xbf16>
    %3 = arith.extf %2 : vector<1x8x8xbf16> to vector<1x8x8xf32>
    %c0_5 = arith.constant 0 : index
    %c0_6 = arith.constant 0 : index
    %4 = vector.load %arg3[%c0_5, %c0_6] : memref<1x32xf32, #tpu.memory_space<vmem>>, vector<1x32xf32>
    %c0_7 = arith.constant 0 : index
    %c0_8 = arith.constant 0 : index
    %5 = vector.load %arg4[%c0_7, %c0_8] : memref<1x32xf32, #tpu.memory_space<vmem>>, vector<1x32xf32>
    %cst = arith.constant dense<0.000000e+00> : vector<8xf32>
    %6 = vector.multi_reduction <add>, %1, %cst [1] : vector<8x32xf32> to vector<8xf32>
    %7 = vector.shape_cast %6 : vector<8xf32> to vector<8x1xf32>
    %cst_9 = arith.constant 3.200000e+01 : f32
    %8 = vector.broadcast %cst_9 : f32 to vector<8x1xf32>
    %9 = arith.divf %7, %8 : vector<8x1xf32>
    %10 = vector.broadcast %9 : vector<8x1xf32> to vector<8x32xf32>
    %11 = arith.subf %1, %10 : vector<8x32xf32>
    %12 = arith.mulf %11, %11 : vector<8x32xf32>
    %cst_10 = arith.constant dense<0.000000e+00> : vector<8xf32>
    %13 = vector.multi_reduction <add>, %12, %cst_10 [1] : vector<8x32xf32> to vector<8xf32>
    %14 = vector.shape_cast %13 : vector<8xf32> to vector<8x1xf32>
    %cst_11 = arith.constant 3.200000e+01 : f32
    %15 = vector.broadcast %cst_11 : f32 to vector<8x1xf32>
    %16 = arith.divf %14, %15 : vector<8x1xf32>
    %17 = vector.broadcast %9 : vector<8x1xf32> to vector<8x32xf32>
    %18 = arith.subf %1, %17 : vector<8x32xf32>
    %cst_12 = arith.constant 9.99999974E-6 : f32
    %19 = vector.broadcast %cst_12 : f32 to vector<8x1xf32>
    %20 = arith.addf %16, %19 : vector<8x1xf32>
    %21 = math.rsqrt %20 : vector<8x1xf32>
    %22 = vector.broadcast %21 : vector<8x1xf32> to vector<8x32xf32>
    %23 = arith.mulf %18, %22 : vector<8x32xf32>
    %24 = vector.broadcast %4 : vector<1x32xf32> to vector<8x32xf32>
    %25 = arith.mulf %23, %24 : vector<8x32xf32>
    %26 = vector.broadcast %5 : vector<1x32xf32> to vector<8x32xf32>
    %27 = arith.addf %25, %26 : vector<8x32xf32>
    %28 = arith.truncf %27 : vector<8x32xf32> to vector<8x32xbf16>
    %c0_13 = arith.constant 0 : index
    %c0_14 = arith.constant 0 : index
    %29 = vector.load %arg5[%c0_13, %c0_14] : memref<32x96xbf16, #tpu.memory_space<vmem>>, vector<32x96xbf16>
    %cst_15 = arith.constant dense<0.000000e+00> : vector<8x96xf32>
    %30 = tpu.matmul %28, %29, %cst_15 {dimension_numbers = #tpu.dot_dimension_numbers<[1], [0], [0], [1], [0, 0, 1, 1], [], []>} : vector<8x32xbf16>, vector<32x96xbf16>, vector<8x96xf32> -> vector<8x96xf32>
    %31 = vector.extract_strided_slice %30 {offsets = [0, 0], sizes = [8, 8], strides = [1, 1]} : vector<8x96xf32> to vector<8x8xf32>
    %32 = vector.extract_strided_slice %30 {offsets = [0, 8], sizes = [8, 8], strides = [1, 1]} : vector<8x96xf32> to vector<8x8xf32>
    %33 = vector.extract_strided_slice %30 {offsets = [0, 16], sizes = [8, 8], strides = [1, 1]} : vector<8x96xf32> to vector<8x8xf32>
    %34 = vector.extract_strided_slice %30 {offsets = [0, 24], sizes = [8, 8], strides = [1, 1]} : vector<8x96xf32> to vector<8x8xf32>
    %35 = vector.shape_cast %31 : vector<8x8xf32> to vector<1x8x8xf32>
    %36 = vector.shape_cast %32 : vector<8x8xf32> to vector<1x8x8xf32>
    %37 = vector.shape_cast %33 : vector<8x8xf32> to vector<1x8x8xf32>
    %38 = vector.shape_cast %34 : vector<8x8xf32> to vector<1x8x8xf32>
    %39 = tpu.concatenate %35, %36, %37, %38 in 0 : vector<1x8x8xf32>, vector<1x8x8xf32>, vector<1x8x8xf32>, vector<1x8x8xf32> -> vector<4x8x8xf32>
    %40 = arith.truncf %39 : vector<4x8x8xf32> to vector<4x8x8xbf16>
    %41 = vector.extract_strided_slice %30 {offsets = [0, 32], sizes = [8, 8], strides = [1, 1]} : vector<8x96xf32> to vector<8x8xf32>
    %42 = vector.extract_strided_slice %30 {offsets = [0, 40], sizes = [8, 8], strides = [1, 1]} : vector<8x96xf32> to vector<8x8xf32>
    %43 = vector.extract_strided_slice %30 {offsets = [0, 48], sizes = [8, 8], strides = [1, 1]} : vector<8x96xf32> to vector<8x8xf32>
    %44 = vector.extract_strided_slice %30 {offsets = [0, 56], sizes = [8, 8], strides = [1, 1]} : vector<8x96xf32> to vector<8x8xf32>
    %45 = vector.shape_cast %41 : vector<8x8xf32> to vector<1x8x8xf32>
    %46 = vector.shape_cast %42 : vector<8x8xf32> to vector<1x8x8xf32>
    %47 = vector.shape_cast %43 : vector<8x8xf32> to vector<1x8x8xf32>
    %48 = vector.shape_cast %44 : vector<8x8xf32> to vector<1x8x8xf32>
    %49 = tpu.concatenate %45, %46, %47, %48 in 0 : vector<1x8x8xf32>, vector<1x8x8xf32>, vector<1x8x8xf32>, vector<1x8x8xf32> -> vector<4x8x8xf32>
    %50 = arith.truncf %49 : vector<4x8x8xf32> to vector<4x8x8xbf16>
    %51 = vector.extract_strided_slice %30 {offsets = [0, 64], sizes = [8, 8], strides = [1, 1]} : vector<8x96xf32> to vector<8x8xf32>
    %52 = vector.extract_strided_slice %30 {offsets = [0, 72], sizes = [8, 8], strides = [1, 1]} : vector<8x96xf32> to vector<8x8xf32>
    %53 = vector.extract_strided_slice %30 {offsets = [0, 80], sizes = [8, 8], strides = [1, 1]} : vector<8x96xf32> to vector<8x8xf32>
    %54 = vector.extract_strided_slice %30 {offsets = [0, 88], sizes = [8, 8], strides = [1, 1]} : vector<8x96xf32> to vector<8x8xf32>
    %55 = vector.shape_cast %51 : vector<8x8xf32> to vector<1x8x8xf32>
    %56 = vector.shape_cast %52 : vector<8x8xf32> to vector<1x8x8xf32>
    %57 = vector.shape_cast %53 : vector<8x8xf32> to vector<1x8x8xf32>
    %58 = vector.shape_cast %54 : vector<8x8xf32> to vector<1x8x8xf32>
    %59 = tpu.concatenate %55, %56, %57, %58 in 0 : vector<1x8x8xf32>, vector<1x8x8xf32>, vector<1x8x8xf32>, vector<1x8x8xf32> -> vector<4x8x8xf32>
    %60 = arith.truncf %59 : vector<4x8x8xf32> to vector<4x8x8xbf16>
    %cst_16 = arith.constant 0xFF800000 : f32
    %61 = vector.broadcast %cst_16 : f32 to vector<4x8x1xf32>
    %cst_17 = arith.constant 0.000000e+00 : f32
    %62 = vector.broadcast %cst_17 : f32 to vector<4x8x1xf32>
    %cst_18 = arith.constant 0.000000e+00 : f32
    %63 = vector.broadcast %cst_18 : f32 to vector<4x8x8xf32>
    "tpu.trace_start"() <{level = 10 : i32, message = "bqd,bkd->bqk"}> : () -> ()
    %cst_19 = arith.constant dense<0.000000e+00> : vector<4x8x8xf32>
    %64 = tpu.matmul %40, %50, %cst_19 {dimension_numbers = #tpu.dot_dimension_numbers<[2], [2], [1], [1], [0, 0, 0, 1, 1, 1], [0], [0]>} : vector<4x8x8xbf16>, vector<4x8x8xbf16>, vector<4x8x8xf32> -> vector<4x8x8xf32>
    "tpu.trace_stop"() : () -> ()
    %cst_20 = arith.constant 0.353553385 : f32
    %65 = vector.broadcast %cst_20 : f32 to vector<4x8x8xf32>
    %66 = arith.mulf %64, %65 : vector<4x8x8xf32>
    %67 = vector.shape_cast %66 : vector<4x8x8xf32> to vector<4x1x8x8xf32>
    %68 = vector.shape_cast %3 : vector<1x8x8xf32> to vector<1x1x8x8xf32>
    %69 = vector.broadcast %68 : vector<1x1x8x8xf32> to vector<4x1x8x8xf32>
    %70 = arith.addf %67, %69 : vector<4x1x8x8xf32>
    %71 = vector.shape_cast %70 : vector<4x1x8x8xf32> to vector<4x8x8xf32>
    %cst_21 = arith.constant dense<0xFF800000> : vector<4x8xf32>
    %72 = vector.multi_reduction <maximumf>, %71, %cst_21 [2] : vector<4x8x8xf32> to vector<4x8xf32>
    %73 = vector.shape_cast %72 : vector<4x8xf32> to vector<4x8x1xf32>
    %74 = arith.maximumf %61, %73 : vector<4x8x1xf32>
    %75 = arith.subf %61, %74 : vector<4x8x1xf32>
    %76 = math.exp %75 : vector<4x8x1xf32>
    %77 = vector.broadcast %74 : vector<4x8x1xf32> to vector<4x8x8xf32>
    %78 = arith.subf %71, %77 : vector<4x8x8xf32>
    %79 = math.exp %78 : vector<4x8x8xf32>
    %80 = arith.mulf %76, %62 : vector<4x8x1xf32>
    %cst_22 = arith.constant dense<0.000000e+00> : vector<4x8xf32>
    %81 = vector.multi_reduction <add>, %79, %cst_22 [2] : vector<4x8x8xf32> to vector<4x8xf32>
    %82 = vector.shape_cast %81 : vector<4x8xf32> to vector<4x8x1xf32>
    %83 = arith.addf %80, %82 : vector<4x8x1xf32>
    %84 = vector.broadcast %76 : vector<4x8x1xf32> to vector<4x8x8xf32>
    %85 = arith.mulf %84, %63 : vector<4x8x8xf32>
    %86 = arith.truncf %79 : vector<4x8x8xf32> to vector<4x8x8xbf16>
    "tpu.trace_start"() <{level = 10 : i32, message = "bqk,bkd->bqd"}> : () -> ()
    %cst_23 = arith.constant dense<0.000000e+00> : vector<4x8x8xf32>
    %87 = tpu.matmul %86, %60, %cst_23 {dimension_numbers = #tpu.dot_dimension_numbers<[2], [1], [1], [2], [0, 0, 0, 1, 1, 2], [0], [0]>} : vector<4x8x8xbf16>, vector<4x8x8xbf16>, vector<4x8x8xf32> -> vector<4x8x8xf32>
    "tpu.trace_stop"() : () -> ()
    %88 = arith.addf %85, %87 : vector<4x8x8xf32>
    %89 = tpu.reciprocal %83 {approx = true} : vector<4x8x1xf32> -> vector<4x8x1xf32>
    %90 = vector.broadcast %89 : vector<4x8x1xf32> to vector<4x8x8xf32>
    %91 = arith.mulf %88, %90 : vector<4x8x8xf32>
    %92 = vector.extract_strided_slice %91 {offsets = [0, 0, 0], sizes = [1, 8, 8], strides = [1, 1, 1]} : vector<4x8x8xf32> to vector<1x8x8xf32>
    %93 = vector.shape_cast %92 : vector<1x8x8xf32> to vector<8x8xf32>
    %94 = vector.extract_strided_slice %91 {offsets = [1, 0, 0], sizes = [1, 8, 8], strides = [1, 1, 1]} : vector<4x8x8xf32> to vector<1x8x8xf32>
    %95 = vector.shape_cast %94 : vector<1x8x8xf32> to vector<8x8xf32>
    %96 = vector.extract_strided_slice %91 {offsets = [2, 0, 0], sizes = [1, 8, 8], strides = [1, 1, 1]} : vector<4x8x8xf32> to vector<1x8x8xf32>
    %97 = vector.shape_cast %96 : vector<1x8x8xf32> to vector<8x8xf32>
    %98 = vector.extract_strided_slice %91 {offsets = [3, 0, 0], sizes = [1, 8, 8], strides = [1, 1, 1]} : vector<4x8x8xf32> to vector<1x8x8xf32>
    %99 = vector.shape_cast %98 : vector<1x8x8xf32> to vector<8x8xf32>
    %100 = tpu.concatenate %93, %95, %97, %99 in 1 : vector<8x8xf32>, vector<8x8xf32>, vector<8x8xf32>, vector<8x8xf32> -> vector<8x32xf32>
    %101 = arith.truncf %100 : vector<8x32xf32> to vector<8x32xbf16>
    %c0_24 = arith.constant 0 : index
    %c0_25 = arith.constant 0 : index
    %102 = vector.load %arg6[%c0_24, %c0_25] : memref<32x32xbf16, #tpu.memory_space<vmem>>, vector<32x32xbf16>
    %cst_26 = arith.constant dense<0.000000e+00> : vector<8x32xf32>
    %103 = tpu.matmul %101, %102, %cst_26 {dimension_numbers = #tpu.dot_dimension_numbers<[1], [0], [0], [1], [0, 0, 1, 1], [], []>} : vector<8x32xbf16>, vector<32x32xbf16>, vector<8x32xf32> -> vector<8x32xf32>
    %c0_27 = arith.constant 0 : index
    %c0_28 = arith.constant 0 : index
    %104 = vector.load %arg7[%c0_27, %c0_28] : memref<1x32xf32, #tpu.memory_space<vmem>>, vector<1x32xf32>
    %105 = vector.broadcast %104 : vector<1x32xf32> to vector<8x32xf32>
    %106 = arith.addf %103, %105 : vector<8x32xf32>
    %107 = arith.addf %1, %106 : vector<8x32xf32>
    %c0_29 = arith.constant 0 : index
    %c0_30 = arith.constant 0 : index
    %108 = vector.load %arg8[%c0_29, %c0_30] : memref<1x32xf32, #tpu.memory_space<vmem>>, vector<1x32xf32>
    %c0_31 = arith.constant 0 : index
    %c0_32 = arith.constant 0 : index
    %109 = vector.load %arg9[%c0_31, %c0_32] : memref<1x32xf32, #tpu.memory_space<vmem>>, vector<1x32xf32>
    %cst_33 = arith.constant dense<0.000000e+00> : vector<8xf32>
    %110 = vector.multi_reduction <add>, %107, %cst_33 [1] : vector<8x32xf32> to vector<8xf32>
    %111 = vector.shape_cast %110 : vector<8xf32> to vector<8x1xf32>
    %cst_34 = arith.constant 3.200000e+01 : f32
    %112 = vector.broadcast %cst_34 : f32 to vector<8x1xf32>
    %113 = arith.divf %111, %112 : vector<8x1xf32>
    %114 = vector.broadcast %113 : vector<8x1xf32> to vector<8x32xf32>
    %115 = arith.subf %107, %114 : vector<8x32xf32>
    %116 = arith.mulf %115, %115 : vector<8x32xf32>
    %cst_35 = arith.constant dense<0.000000e+00> : vector<8xf32>
    %117 = vector.multi_reduction <add>, %116, %cst_35 [1] : vector<8x32xf32> to vector<8xf32>
    %118 = vector.shape_cast %117 : vector<8xf32> to vector<8x1xf32>
    %cst_36 = arith.constant 3.200000e+01 : f32
    %119 = vector.broadcast %cst_36 : f32 to vector<8x1xf32>
    %120 = arith.divf %118, %119 : vector<8x1xf32>
    %121 = vector.broadcast %113 : vector<8x1xf32> to vector<8x32xf32>
    %122 = arith.subf %107, %121 : vector<8x32xf32>
    %cst_37 = arith.constant 9.99999974E-6 : f32
    %123 = vector.broadcast %cst_37 : f32 to vector<8x1xf32>
    %124 = arith.addf %120, %123 : vector<8x1xf32>
    %125 = math.rsqrt %124 : vector<8x1xf32>
    %126 = vector.broadcast %125 : vector<8x1xf32> to vector<8x32xf32>
    %127 = arith.mulf %122, %126 : vector<8x32xf32>
    %128 = vector.broadcast %108 : vector<1x32xf32> to vector<8x32xf32>
    %129 = arith.mulf %127, %128 : vector<8x32xf32>
    %130 = vector.broadcast %109 : vector<1x32xf32> to vector<8x32xf32>
    %131 = arith.addf %129, %130 : vector<8x32xf32>
    %132 = arith.truncf %131 : vector<8x32xf32> to vector<8x32xbf16>
    %cst_38 = arith.constant 0.000000e+00 : f32
    %133 = vector.broadcast %cst_38 : f32 to vector<8x32xf32>
    %c0_39 = arith.constant 0 : index
    %c0_40 = arith.constant 0 : index
    %134 = vector.load %arg10[%c0_39, %c0_40] : memref<32x128xbf16, #tpu.memory_space<vmem>>, vector<32x128xbf16>
    %cst_41 = arith.constant dense<0.000000e+00> : vector<8x128xf32>
    %135 = tpu.matmul %132, %134, %cst_41 {dimension_numbers = #tpu.dot_dimension_numbers<[1], [0], [0], [1], [0, 0, 1, 1], [], []>} : vector<8x32xbf16>, vector<32x128xbf16>, vector<8x128xf32> -> vector<8x128xf32>
    %c0_42 = arith.constant 0 : index
    %c0_43 = arith.constant 0 : index
    %136 = vector.load %arg11[%c0_42, %c0_43] : memref<1x128xf32, #tpu.memory_space<vmem>>, vector<1x128xf32>
    %137 = vector.broadcast %136 : vector<1x128xf32> to vector<8x128xf32>
    %138 = arith.addf %135, %137 : vector<8x128xf32>
    %cst_44 = arith.constant 0.000000e+00 : f32
    %139 = vector.broadcast %cst_44 : f32 to vector<8x128xf32>
    %140 = arith.maximumf %138, %139 : vector<8x128xf32>
    %141 = arith.truncf %140 : vector<8x128xf32> to vector<8x128xbf16>
    %c0_45 = arith.constant 0 : index
    %c0_46 = arith.constant 0 : index
    %142 = vector.load %arg12[%c0_45, %c0_46] : memref<128x32xbf16, #tpu.memory_space<vmem>>, vector<128x32xbf16>
    %cst_47 = arith.constant dense<0.000000e+00> : vector<8x32xf32>
    %143 = tpu.matmul %141, %142, %cst_47 {dimension_numbers = #tpu.dot_dimension_numbers<[1], [0], [0], [1], [0, 0, 1, 1], [], []>} : vector<8x128xbf16>, vector<128x32xbf16>, vector<8x32xf32> -> vector<8x32xf32>
    %144 = arith.addf %133, %143 : vector<8x32xf32>
    %c0_48 = arith.constant 0 : index
    %c0_49 = arith.constant 0 : index
    %145 = vector.load %arg13[%c0_48, %c0_49] : memref<1x32xf32, #tpu.memory_space<vmem>>, vector<1x32xf32>
    %146 = vector.broadcast %145 : vector<1x32xf32> to vector<8x32xf32>
    %147 = arith.addf %144, %146 : vector<8x32xf32>
    %148 = arith.addf %107, %147 : vector<8x32xf32>
    %149 = vector.shape_cast %148 : vector<8x32xf32> to vector<1x8x32xf32>
    %c0_50 = arith.constant 0 : index
    %c0_51 = arith.constant 0 : index
    %c0_52 = arith.constant 0 : index
    %150 = vector.load %arg14[%c0_50, %c0_51, %c0_52] : memref<1x8x32xf32, #tpu.memory_space<vmem>>, vector<1x8x32xf32>
    tpu.vector_store %arg14[%c0_50, %c0_51, %c0_52], %149 {strides = array<i32>} : memref<1x8x32xf32, #tpu.memory_space<vmem>>, vector<1x8x32xf32>,
    return
  }
  func.func @transform_0(%arg0: i32) -> (i32, i32, i32) {
    %c0_i32 = arith.constant 0 : i32
    %c0_i32_0 = arith.constant 0 : i32
    %c0_i32_1 = arith.constant 0 : i32
    return %arg0, %c0_i32, %c0_i32_0 : i32, i32, i32
  }
  func.func @transform_1(%arg0: i32) -> (i32, i32, i32) {
    %c0_i32 = arith.constant 0 : i32
    %c0_i32_0 = arith.constant 0 : i32
    %c0_i32_1 = arith.constant 0 : i32
    return %arg0, %c0_i32, %c0_i32_0 : i32, i32, i32
  }
  func.func @transform_2(%arg0: i32) -> (i32, i32) {
    %c0_i32 = arith.constant 0 : i32
    %c0_i32_0 = arith.constant 0 : i32
    %c0_i32_1 = arith.constant 0 : i32
    return %c0_i32, %c0_i32_0 : i32, i32
  }
  func.func @transform_3(%arg0: i32) -> (i32, i32) {
    %c0_i32 = arith.constant 0 : i32
    %c0_i32_0 = arith.constant 0 : i32
    %c0_i32_1 = arith.constant 0 : i32
    return %c0_i32, %c0_i32_0 : i32, i32
  }
  func.func @transform_4(%arg0: i32) -> (i32, i32) {
    %c0_i32 = arith.constant 0 : i32
    %c0_i32_0 = arith.constant 0 : i32
    %c0_i32_1 = arith.constant 0 : i32
    return %c0_i32, %c0_i32_0 : i32, i32
  }
  func.func @transform_5(%arg0: i32) -> (i32, i32) {
    %c0_i32 = arith.constant 0 : i32
    %c0_i32_0 = arith.constant 0 : i32
    %c0_i32_1 = arith.constant 0 : i32
    return %c0_i32, %c0_i32_0 : i32, i32
  }
  func.func @transform_6(%arg0: i32) -> (i32, i32) {
    %c0_i32 = arith.constant 0 : i32
    %c0_i32_0 = arith.constant 0 : i32
    %c0_i32_1 = arith.constant 0 : i32
    return %c0_i32, %c0_i32_0 : i32, i32
  }
  func.func @transform_7(%arg0: i32) -> (i32, i32) {
    %c0_i32 = arith.constant 0 : i32
    %c0_i32_0 = arith.constant 0 : i32
    %c0_i32_1 = arith.constant 0 : i32
    return %c0_i32, %c0_i32_0 : i32, i32
  }
  func.func @transform_8(%arg0: i32) -> (i32, i32) {
    %c0_i32 = arith.constant 0 : i32
    %c0_i32_0 = arith.constant 0 : i32
    %c0_i32_1 = arith.constant 0 : i32
    return %c0_i32, %c0_i32_0 : i32, i32
  }
  func.func @transform_9(%arg0: i32) -> (i32, i32) {
    %c0_i32 = arith.constant 0 : i32
    %c0_i32_0 = arith.constant 0 : i32
    %c0_i32_1 = arith.constant 0 : i32
    return %c0_i32, %c0_i32_0 : i32, i32
  }
  func.func @transform_10(%arg0: i32) -> (i32, i32) {
    %c0_i32 = arith.constant 0 : i32
    %c0_i32_0 = arith.constant 0 : i32
    %c0_i32_1 = arith.constant 0 : i32
    return %c0_i32, %c0_i32_0 : i32, i32
  }
  func.func @transform_11(%arg0: i32) -> (i32, i32) {
    %c0_i32 = arith.constant 0 : i32
    %c0_i32_0 = arith.constant 0 : i32
    %c0_i32_1 = arith.constant 0 : i32
    return %c0_i32, %c0_i32_0 : i32, i32
  }
  func.func @transform_12(%arg0: i32) -> (i32, i32) {
    %c0_i32 = arith.constant 0 : i32
    %c0_i32_0 = arith.constant 0 : i32
    %c0_i32_1 = arith.constant 0 : i32
    return %c0_i32, %c0_i32_0 : i32, i32
  }
  func.func @transform_13(%arg0: i32) -> (i32, i32, i32) {
    %c0_i32 = arith.constant 0 : i32
    %c0_i32_0 = arith.constant 0 : i32
    %c0_i32_1 = arith.constant 0 : i32
    return %arg0, %c0_i32, %c0_i32_0 : i32, i32, i32
  }
}

</mosaic_0001>

<bundles_post_ra>
// kernel: tpu_custom_call.1
= control target key start
LH: loop header
LB: loop body
LE: loop exit
PB: predicated region body
PF: predicated region fallthrough
CT: control target
= control target key end

     0   :  { %s2103_s0 = inlined_call_operand.vmem [shape: f32[2,8,32], index: 0, kind: input, shape index: {}]   ;;  %s2104_s1 = inlined_call_operand.vmem [shape: bf16[2,8,8], index: 1, kind: input, shape index: {}]   ;;  %s2105_s2 = inlined_call_operand.vmem [shape: f32[1,32], index: 2, kind: input, shape index: {}]   ;;  %s2106_s3 = inlined_call_operand.vmem [shape: f32[1,32], index: 3, kind: input, shape index: {}]   ;;  %s2107_s4 = inlined_call_operand.vmem [shape: bf16[32,96], index: 4, kind: input, shape index: {}]   ;;  %s2108_s5 = inlined_call_operand.vmem [shape: bf16[32,32], index: 5, kind: input, shape index: {}]   ;;  %s2109_s6 = inlined_call_operand.vmem [shape: f32[1,32], index: 6, kind: input, shape index: {}]   ;;  %s2110_s7 = inlined_call_operand.vmem [shape: f32[1,32], index: 7, kind: input, shape index: {}]   ;;  %s2111_s8 = inlined_call_operand.vmem [shape: f32[1,32], index: 8, kind: input, shape index: {}]   ;;  %s2112_s9 = inlined_call_operand.vmem [shape: bf16[32,128], index: 9, kind: input, shape index: {}]   ;;  %s2113_s10 = inlined_call_operand.vmem [shape: f32[1,128], index: 10, kind: input, shape index: {}]   ;;  %s2114_s11 = inlined_call_operand.vmem [shape: bf16[128,32], index: 11, kind: input, shape index: {}]   ;;  %s2115_s12 = inlined_call_operand.vmem [shape: f32[1,32], index: 12, kind: input, shape index: {}]   ;;  %s2116_s13 = inlined_call_operand.hbm [shape: f32[2,8,32], index: 13, kind: output, shape index: {}]  }
   0x1   :  { %2117 = sst [smem:[#allocation5_spill]] %s2103_s0 }
   0x2   :  { %2118 = sst [smem:[#allocation6_spill]] %s2104_s1 }
   0x3   :  { %2119 = sst [smem:[#allocation7_spill]] %s2105_s2 }
   0x4   :  { %18 = vsyncpa [#allocation3], 0 }
   0x5   :  { %20 = vsyncpa [#allocation3 + $0x1], 0  ;;  %s1818_s25 = smov 0   ;;  %s1820_s26 = smov 0  }
   0x6   :  { %s1822_s27 = smov 0   ;;  %s1824_s28 = smov 0  }
   0x7 LB: > { %s1839_s29 = sadd.s32 4294967295, %s1735_s28   ;;  %s1413_s30 = sadd.s32 4294967294, %s1735_s28   ;;  %s1735_s28 = sphi %s1824_s28, %s2128_s28   ;;  %s1731_s27 = sphi %s1822_s27, %s2127_s27   ;;  %s1727_s26 = sphi %s1820_s26, %s2126_s26   ;;  %s1723_s25 = sphi %s1818_s25, %s2125_s25  }
   0x8   : > { %s1843_s14 = sadd.s32 1, %s1735_s28   ;;  %s316_s15 = sadd.s32 1, %s1731_s27 }
   0x9   : > { %s313_s16 = ssub.s32 %s1735_s28, %s1843_s14  ;;  %p326_p0 = scmp.ne.s32.totalorder %s1731_s27, %s1727_s26 }
   0xa   : > { %p314_p1 = scmp.eq.s32.totalorder %s313_s16, 0  ;;  %p327_p2 = scmp.eq.s32.totalorder %s1839_s29, 1 }
   0xb   : > { %p332_p3 = scmp.ne.s32.totalorder %s1727_s26, %s1723_s25  ;;  %p333_p4 = scmp.eq.s32.totalorder %s1413_s30, 1 }
   0xc   : > { %s1854_s17 = scalar_select %p314_p1, %s1731_s27, %s316_s15  }
   0xd   : > { %p1856_p5 = por %p327_p2, %p326_p0  ;;  %p1860_p6 = por %p333_p4, %p332_p3 }
   0xe   : > { %p1416_p7 = scmp.ge.s32.totalorder %s1735_s28, 1  ;;  %p398_p8 = scmp.lt.s32.totalorder %s1735_s28, 3 }
  0x10   : > { %p399_p9 = pnand %p1416_p7, %p398_p8 }
  0x11   : > { %p445_p10 = scmp.lt.s32.totalorder (!%p399_p9), %s1839_s29, 1  ;;  %vm459_vm0 = vcmask (!%p399_p9), 261120   ;;  %s2122_s0 = sld [smem:[#allocation5_spill]] (!%p399_p9)  ;;  %v1631_v7 = vld [vmem:[%s2107_s4] sm:$0xff] (!%p399_p9)   ;;  %v1737_v8 = vmov (!%p399_p9), 0.0   ;;  %vm1738_vm1 = vmmov (!%p399_p9), 0  }
  0x12   : > { %402 = sbr.rel (%p399_p9) target bundleno = 2494 (0x9be), region = 72  ;;  %1490 = vmatprep.subr.bf16.mxu0 (!%p399_p9), %v1737_v8  ;;  %1494 = vmatprep.mubr.msk.bf16.mxu0 (!%p399_p9), %vm1738_vm1, %v1737_v8  ;;  %v1632_v9 = vld [vmem:[%s2107_s4 + $0x8] sm:$0xff] (!%p399_p9)   ;;  %s2123_s2 = sld [smem:[#allocation7_spill]] (!%p399_p9)  ;;  %v1421_v16 = vld [vmem:[%s2106_s3] ss:$0 sm:$0xff] (!%p399_p9)  ;;  %vm565_vm2 = vcmask (!%p399_p9), 64512  }
  0x13   : > { %1491 = vmatpush3.bf16.msra.mxu0 (!%p399_p9), %v1631_v7  ;;  %1510 = vmatprep.subr.bf16.mxu1 (!%p399_p9), %v1737_v8  ;;  %s1739_s15 = smov (!%p399_p9), 104   ;;  %s1740_s16 = smov (!%p399_p9), 120   ;;  %vm832_vm3 = vcmask (!%p399_p9), 1043456   ;;  %vm1045_vm4 = vcmask (!%p399_p9), 130048   ;;  %vm1047_vm5 = vcmask (!%p399_p9), 195584  }
  0x14   : > { %1492 = vmatprep.subr.bf16.mxu0 (!%p399_p9), %v1737_v8  ;;  %1512 = vmatprep.mubr.msk.bf16.mxu1 (!%p399_p9), %vm1738_vm1, %v1737_v8  ;;  %s1742_s22 = smov (!%p399_p9), 96   ;;  %s1743_s23 = smov (!%p399_p9), 64  }
  0x15   : > { %s2124_s1 = sld [smem:[#allocation6_spill]] (!%p399_p9)  ;;  %s1745_s30 = smov (!%p399_p9), 16  }
  0x17   : > { %1493 = vmatpush3.bf16.msra.mxu0 (!%p399_p9), %v1632_v9 }
  0x18   : > { %1498 = vmatprep.subr.bf16.mxu0 (!%p399_p9), %v1737_v8  ;;  %v1420_v14 = vld [vmem:[%s2123_s2] ss:$0 sm:$0xff] (!%p399_p9) }
  0x19   : > { %s1868_s20 = scalar_select %p445_p10, %s1839_s29, 1 }
  0x1b   : > { %s1418_s21 = sshll.u32 %s1868_s20, 3 }
  0x1c   : > { %s448_s24 = scalar_lea.vmem %s2122_s0, %s1418_s21  ;;  %s1741_s21 = smov 112  }
  0x1d   : > { %v1874_v0 = vld [vmem:[%s448_s24] sm:$0xff]  ;;  %s1419_s24 = sshll.u32 %s1868_s20, 2 }
  0x1e   : > { %v460_v1 = vsel %vm459_vm0, %v1874_v0, 0.0 }
  0x1f   : > { %461 = vadd.xlane.f32.xlu0 %v460_v1 }
  0xac   : > { %v462_v2 = vpop.xlane.xlu0 %461 }
  0xad   : > { %v464_v3 = vmul.f32 0.03125, %v462_v2 }
  0xaf   : > { %v465_v4 = vsub.f32 %v1874_v0, %v464_v3 }
  0xb1   : > { %v466_v5 = vmul.f32 %v465_v4, %v465_v4 }
  0xb3   : > { %v467_v6 = vsel %vm459_vm0, %v466_v5, 0.0 }
  0xb4   : > { %468 = vadd.xlane.f32.xlu0 %v467_v6 }
 0x141   : > { %v469_v10 = vpop.xlane.xlu0 %468 }
 0x142   : > { %v470_v11 = vmul.f32 0.03125, %v469_v10 }
 0x144   : > { %v471_v12 = vadd.f32 1e-05, %v470_v11 }
 0x146   : > { %1645 = vrsqrt.f32 %v471_v12 }
 0x150   : > { %v1646_v13 = vpop.eup %1645 }
 0x151   : > { %v473_v15 = vmul.f32 %v1646_v13, %v465_v4 }
 0x153   : > { %v480_v17 = vmul.f32 %v1420_v14, %v473_v15 }
 0x155   : > { %v487_v18 = vadd.f32 %v1421_v16, %v480_v17 }
 0x157   : > { %v488_v19 = vpack.c.bf16 %v487_v18, %v487_v18 }
 0x159   : > { %1495 = vmatmul.mubr.msk.bf16.vlgmr.msra.gmra.mrb[0].mxu0 %vm459_vm0, %v488_v19 }
 0x15a   : > { %1500 = vmatprep.mubr.msk.bf16.mxu0 %vm1738_vm1, %v1737_v8 }
 0x22c   : > { %v542_v20 = vpop.f32.mrb[0].mxu0 }
 0x22d   : > { %555 = vrot.lane.b32.xlu0 %v542_v20, %s1739_s15  ;;  %549 = vrot.lane.b32.xlu1 %v542_v20, %s1740_s16  ;;  %v1496_v21 = vpop.f32.mrb[1].mxu0  ;;  %v558_v24 = vpack.c.bf16 %v542_v20, %v542_v20  ;;  %s452_s16 = scalar_lea.vmem %s2124_s1, %s1419_s24  ;;  %s1744_s24 = smov 8  }
 0x22e   : > { %v545_v22 = vpop.f32.mrb[2].mxu0  ;;  %v455_v41 = vld [vmem:[%s452_s16] sm:$0xf]  ;;  %s1746_s15 = smov 24   ;;  %s1453_s16 = sshll.u32 %s1839_s29, 7 }
 0x22f   : > { %v1497_v23 = vpop.f32.mrb[3].mxu0  ;;  %v456_v42 = vunpack.c.l.bf16 %v455_v41  ;;  %s2060_s1 = scalar_lea.hbm %s2116_s13, %s1453_s16 }
 0x231   : > { %552 = vrot.lane.b32.xlu1 %v542_v20, %s1741_s21 }
 0x235   : > { %563 = vrot.lane.b32.xlu1 %v558_v24, %s1742_s22 }
 0x29f   : > { %v550_v25 = vpop.permute.xlu1 %549  ;;  %v556_v29 = vpop.permute.xlu0 %555 }
 0x2a0   : > { %v1903_v26 = vpack.c.bf16 %v550_v25, %v550_v25  ;;  %v1909_v31 = vpack.c.bf16 %v556_v29, %v556_v29 }
 0x2a2   : > { %613 = vrot.lane.b32.xlu1 %v1903_v26, %s1742_s22 }
 0x2a3   : > { %v553_v27 = vpop.permute.xlu1 %552 }
 0x2a4   : > { %v1906_v28 = vpack.c.bf16 %v553_v27, %v553_v27 }
 0x2a6   : > { %662 = vrot.lane.b32.xlu1 %v1906_v28, %s1742_s22 }
 0x2a7   : > { %v564_v30 = vpop.permute.xlu1 %563 }
 0x2a8   : > { %v570_v32 = vsel %vm565_vm2, %v564_v30, 0 }
 0x2a9   : > { %1499 = vmatpush3.bf16.xpose.msra.mxu0 %v570_v32 }
 0x2aa   : > { %711 = vrot.lane.b32.xlu1 %v1909_v31, %s1742_s22  ;;  %1504 = vmatprep.subr.bf16.mxu0 %v1737_v8 }
 0x2ae   : > { %827 = vrot.lane.b32.xlu1 %v558_v24, %s1743_s23 }
 0x2b0   : > { %1501 = vmatmul.mubr.msk.bf16.vlgmr.msra.gmra.mrb[4].mxu0 %vm565_vm2, %v558_v24 }
 0x2b1   : > { %1506 = vmatprep.mubr.msk.bf16.mxu0 %vm1738_vm1, %v1737_v8 }
 0x314   : > { %v614_v33 = vpop.permute.xlu1 %613 }
 0x315   : > { %v619_v34 = vsel %vm565_vm2, %v614_v33, 0 }
 0x316   : > { %1505 = vmatpush3.bf16.xpose.msra.mxu0 %v619_v34 }
 0x317   : > { %1516 = vmatprep.subr.bf16.mxu0 %v1737_v8 }
 0x318   : > { %v663_v35 = vpop.permute.xlu1 %662 }
 0x319   : > { %v668_v36 = vsel %vm565_vm2, %v663_v35, 0 }
 0x31a   : > { %1511 = vmatpush3.bf16.xpose.msra.mxu1 %v668_v36 }
 0x31b   : > { %1522 = vmatprep.subr.bf16.mxu1 %v1737_v8 }
 0x31c   : > { %v712_v37 = vpop.permute.xlu1 %711 }
 0x31d   : > { %v717_v38 = vsel %vm565_vm2, %v712_v37, 0  ;;  %1507 = vmatmul.mubr.msk.bf16.vlgmr.msra.gmra.mrb[8].mxu0 %vm565_vm2, %v1903_v26 }
 0x31e   : > { %1517 = vmatpush3.bf16.xpose.msra.mxu0 %v717_v38  ;;  %1518 = vmatprep.mubr.msk.bf16.mxu0 %vm1738_vm1, %v1737_v8 }
 0x31f   : > { %1528 = vmatprep.subr.bf16.mxu0 %v1737_v8 }
 0x320   : > { %v828_v39 = vpop.permute.xlu1 %827 }
 0x321   : > { %v834_v40 = vsel %vm832_vm3, %v828_v39, 0  ;;  %1513 = vmatmul.mubr.msk.bf16.vlgmr.msra.gmra.mrb[0].mxu1 %vm565_vm2, %v1906_v28 }
 0x322   : > { %1523 = vmatpush3.bf16.msra.mxu1 %v834_v40  ;;  %1524 = vmatprep.mubr.msk.bf16.mxu1 %vm1738_vm1, %v1737_v8 }
 0x323   : > { %1534 = vmatprep.subr.bf16.mxu1 %v1737_v8 }
 0x325   : > { %1519 = vmatmul.mubr.msk.bf16.vlgmr.msra.gmra.mrb[12].mxu0 %vm565_vm2, %v1909_v31 }
 0x326   : > { %1530 = vmatprep.mubr.msk.bf16.mxu0 %vm1738_vm1, %v1737_v8 }
 0x383   : > { %v606_v43 = vpop.f32.mrb[4].mxu0 }
 0x384   : > { %v759_v44 = vmul.f32 0.35355338, %v606_v43  ;;  %v1502_v45 = vpop.f32.mrb[5].mxu0 }
 0x385   : > { %v609_v46 = vpop.f32.mrb[6].mxu0 }
 0x386   : > { %v1503_v47 = vpop.f32.mrb[7].mxu0  ;;  %v763_v48 = vadd.f32 %v759_v44, %v456_v42 }
 0x388   : > { %v767_v49 = vsel %vm565_vm2, %v763_v48, -inf }
 0x389   : > { %768 = vmax.xlane.f32.xlu1 %v767_v49 }
 0x3f0   : > { %v655_v50 = vpop.f32.mrb[8].mxu0 }
 0x3f1   : > { %v760_v51 = vmul.f32 0.35355338, %v655_v50  ;;  %v1508_v52 = vpop.f32.mrb[9].mxu0 }
 0x3f2   : > { %v658_v53 = vpop.f32.mrb[10].mxu0 }
 0x3f3   : > { %v1509_v54 = vpop.f32.mrb[11].mxu0  ;;  %v764_v55 = vadd.f32 %v760_v51, %v456_v42 }
 0x3f4   : > { %v704_v56 = vpop.f32.mrb[0].mxu1 }
 0x3f5   : > { %v761_v57 = vmul.f32 0.35355338, %v704_v56  ;;  %v1514_v58 = vpop.f32.mrb[1].mxu1  ;;  %v770_v59 = vsel %vm565_vm2, %v764_v55, -inf }
 0x3f6   : > { %v707_v60 = vpop.f32.mrb[2].mxu1  ;;  %771 = vmax.xlane.f32.xlu0 %v770_v59 }
 0x3f7   : > { %v1515_v61 = vpop.f32.mrb[3].mxu1  ;;  %v765_v62 = vadd.f32 %v761_v57, %v456_v42  ;;  %v1633_v60 = vld [vmem:[%s2108_s5] sm:$0xff]  }
 0x3f8   : > { %v753_v63 = vpop.f32.mrb[12].mxu0 }
 0x3f9   : > { %v762_v1 = vmul.f32 0.35355338, %v753_v63  ;;  %v1520_v2 = vpop.f32.mrb[13].mxu0  ;;  %v773_v3 = vsel %vm565_vm2, %v765_v62, -inf }
 0x3fa   : > { %774 = vmax.xlane.f32.xlu1 %v773_v3  ;;  %v756_v4 = vpop.f32.mrb[14].mxu0 }
 0x3fb   : > { %v1521_v5 = vpop.f32.mrb[15].mxu0  ;;  %v766_v6 = vadd.f32 %v762_v1, %v456_v42 }
 0x3fd   : > { %v776_v7 = vsel %vm565_vm2, %v766_v6, -inf }
 0x3fe   : > { %777 = vmax.xlane.f32.xlu0 %v776_v7 }
 0x40b   : > { %924 = vrot.lane.b32.xlu1 %v1906_v28, %s1743_s23 }
 0x40f   : > { %972 = vrot.lane.b32.xlu1 %v1909_v31, %s1743_s23 }
 0x414   : > { %876 = vrot.lane.b32.xlu0 %v1903_v26, %s1743_s23  ;;  %s442_s23 = sand.u32 1, %s1727_s26  }
 0x415   : > { %s1329_s29 = scalar_lea.sflag [#allocation3], %s442_s23 }
 0x416   : > { %v1952_v9 = vpop.xlane.xlu1 %768 }
 0x417   : > { %v791_v10 = vsub.f32 %v763_v48, %v1952_v9 }
 0x419   : > { %v795_v11 = vmul.f32 1.442695, %v791_v10 }
 0x41b   : > { %1647 = vpow2.f32 %v795_v11 }
 0x425   : > { %v1648_v12 = vpop.eup %1647 }
 0x426   : > { %v823_v13 = vpack.c.bf16 %v1648_v12, %v1648_v12  ;;  %v807_v38 = vsel %vm565_vm2, %v1648_v12, 0.0 }
 0x428   : > { %1525 = vmatmul.mubr.msk.bf16.vlgmr.msra.gmra.mrb[4].mxu1 %vm565_vm2, %v823_v13 }
 0x429   : > { %1536 = vmatprep.mubr.msk.bf16.mxu1 %vm1738_vm1, %v1737_v8 }
 0x483   : > { %v772_v14 = vpop.xlane.xlu0 %771 }
 0x484   : > { %v792_v15 = vsub.f32 %v764_v55, %v772_v14  ;;  %v780_v43 = vsub.f32 -inf, %v772_v14 }
 0x486   : > { %v797_v16 = vmul.f32 1.442695, %v792_v15  ;;  %v785_v44 = vmul.f32 1.442695, %v780_v43 }
 0x487   : > { %v775_v17 = vpop.xlane.xlu1 %774 }
 0x488   : > { %v793_v18 = vsub.f32 %v765_v62, %v775_v17  ;;  %1649 = vpow2.f32 %v797_v16  ;;  %v781_v45 = vsub.f32 -inf, %v775_v17  ;;  %v1634_v62 = vld [vmem:[%s2108_s5 + $0x8] sm:$0xff]  }
 0x48a   : > { %v799_v19 = vmul.f32 1.442695, %v793_v18  ;;  %v787_v46 = vmul.f32 1.442695, %v781_v45 }
 0x48b   : > { %v925_v20 = vpop.permute.xlu1 %924  ;;  %v778_v21 = vpop.xlane.xlu0 %777 }
 0x48c   : > { %v930_v22 = vsel %vm832_vm3, %v925_v20, 0  ;;  %v794_v23 = vsub.f32 %v766_v6, %v778_v21  ;;  %1651 = vpow2.f32 %v799_v19  ;;  %v782_v47 = vsub.f32 -inf, %v778_v21 }
 0x48d   : > { %1535 = vmatpush3.bf16.msra.mxu1 %v930_v22 }
 0x48e   : > { %v801_v24 = vmul.f32 1.442695, %v794_v23  ;;  %1546 = vmatprep.subr.bf16.mxu1 %v1737_v8  ;;  %v789_v48 = vmul.f32 1.442695, %v782_v47  ;;  %v779_v23 = vsub.f32 -inf, %v1952_v9 }
 0x48f   : > { %v877_v25 = vpop.permute.xlu0 %876  ;;  %v973_v28 = vpop.permute.xlu1 %972 }
 0x490   : > { %v882_v26 = vsel %vm832_vm3, %v877_v25, 0  ;;  %1653 = vpow2.f32 %v801_v24  ;;  %v978_v31 = vsel %vm832_vm3, %v973_v28, 0  ;;  %v783_v24 = vmul.f32 1.442695, %v779_v23 }
 0x491   : > { %1529 = vmatpush3.bf16.msra.mxu0 %v882_v26  ;;  %1655 = vpow2.f32 %v785_v44 }
 0x492   : > { %1540 = vmatprep.subr.bf16.mxu0 %v1737_v8  ;;  %v1650_v27 = vpop.eup %1649  ;;  %1657 = vpow2.f32 %v787_v46 }
 0x493   : > { %v810_v29 = vsel %vm565_vm2, %v1650_v27, 0.0  ;;  %v824_v30 = vpack.c.bf16 %v1650_v27, %v1650_v27  ;;  %1659 = vpow2.f32 %v789_v48 }
 0x494   : > { %811 = vadd.xlane.f32.xlu0 %v810_v29 }
 0x495   : > { %1531 = vmatmul.mubr.msk.bf16.vlgmr.msra.gmra.mrb[16].mxu0 %vm565_vm2, %v824_v30 }
 0x496   : > { %v1652_v32 = vpop.eup %1651  ;;  %1541 = vmatpush3.bf16.msra.mxu0 %v978_v31  ;;  %1542 = vmatprep.mubr.msk.bf16.mxu0 %vm1738_vm1, %v1737_v8 }
 0x497   : > { %v813_v33 = vsel %vm565_vm2, %v1652_v32, 0.0  ;;  %v825_v34 = vpack.c.bf16 %v1652_v32, %v1652_v32  ;;  %1554 = vmatprep.subr.bf16.mxu0 %v1737_v8 }
 0x498   : > { %814 = vadd.xlane.f32.xlu1 %v813_v33 }
 0x499   : > { %1537 = vmatmul.mubr.msk.bf16.vlgmr.msra.gmra.mrb[8].mxu1 %vm565_vm2, %v825_v34 }
 0x49a   : > { %v1654_v35 = vpop.eup %1653  ;;  %1550 = vmatprep.mubr.msk.bf16.mxu1 %vm1738_vm1, %v1737_v8  ;;  %1547 = vmatpush3.bf16.msra.mxu1 %v1633_v60 }
 0x49b   : > { %v816_v36 = vsel %vm565_vm2, %v1654_v35, 0.0  ;;  %v826_v37 = vpack.c.bf16 %v1654_v35, %v1654_v35  ;;  %v1656_v49 = vpop.eup %1655  ;;  %1548 = vmatprep.subr.bf16.mxu1 %v1737_v8 }
 0x49c   : > { %817 = vadd.xlane.f32.xlu0 %v816_v36  ;;  %v804_v51 = vmul.f32 0.0, %v1656_v49  ;;  %v1658_v52 = vpop.eup %1657 }
 0x49d   : > { %1543 = vmatmul.mubr.msk.bf16.vlgmr.msra.gmra.mrb[20].mxu0 %vm565_vm2, %v826_v37  ;;  %v805_v55 = vmul.f32 0.0, %v1658_v52  ;;  %v1660_v56 = vpop.eup %1659  ;;  %v1637_v52 = vld [vmem:[%s2114_s11] sm:$0xff]  }
 0x49e   : > { %1558 = vmatprep.mubr.msk.bf16.mxu0 %vm1738_vm1, %v1737_v8  ;;  %v806_v59 = vmul.f32 0.0, %v1660_v56  ;;  %1549 = vmatpush3.bf16.msra.mxu1 %v1634_v62  ;;  %v1641_v56 = vld [vmem:[%s2114_s11 + $0x20] sm:$0xff]  }
 0x49f   : > { %1562 = vmatprep.subr.bf16.mxu1 %v1737_v8  ;;  %v1437_v62 = vld [vmem:[%s2110_s7] ss:$0 sm:$0xff] }
 0x4a0   : > { %808 = vadd.xlane.f32.xlu0 %v807_v38  ;;  %v1433_v38 = vld [vmem:[%s2109_s6] ss:$0 sm:$0xff] }
 0x4fb   : > { %v1977_v39 = vpop.f32.mrb[4].mxu1 }
 0x4fc   : > { %v1526_v40 = vpop.f32.mrb[5].mxu1 }
 0x4fd   : > { %v873_v41 = vpop.f32.mrb[6].mxu1 }
 0x4fe   : > { %v1527_v42 = vpop.f32.mrb[7].mxu1 }
 0x521   : > { %v812_v50 = vpop.xlane.xlu0 %811 }
 0x522   : > { %v820_v53 = vadd.f32 %v812_v50, %v804_v51 }
 0x524   : > { %1661 = vrcp.f32 %v820_v53  ;;  %v1638_v53 = vld [vmem:[%s2114_s11 + $0x8] sm:$0xff]  }
 0x525   : > { %v815_v54 = vpop.xlane.xlu1 %814 }
 0x526   : > { %v821_v57 = vadd.f32 %v815_v54, %v805_v55  ;;  %v1639_v54 = vld [vmem:[%s2114_s11 + $0x10] sm:$0xff]  }
 0x528   : > { %1663 = vrcp.f32 %v821_v57  ;;  %v1642_v57 = vld [vmem:[%s2114_s11 + $0x28] sm:$0xff]  }
 0x529   : > { %v818_v58 = vpop.xlane.xlu0 %817 }
 0x52a   : > { %v822_v61 = vadd.f32 %v818_v58, %v806_v59 }
 0x52c   : > { %1665 = vrcp.f32 %v822_v61 }
 0x52d   : > { %1667 = vpow2.f32 %v783_v24  ;;  %v809_v26 = vpop.xlane.xlu0 %808 }
 0x52e   : > { %v1662_v3 = vpop.eup %1661 }
 0x532   : > { %v1664_v12 = vpop.eup %1663 }
 0x536   : > { %v1666_v19 = vpop.eup %1665 }
 0x537   : > { %v1668_v25 = vpop.eup %1667 }
 0x538   : > { %v803_v27 = vmul.f32 0.0, %v1668_v25 }
 0x53a   : > { %v819_v28 = vadd.f32 %v809_v26, %v803_v27  ;;  %v1020_v30 = vadd.f32 %v1977_v39, %v803_v27 }
 0x53c   : > { %1669 = vrcp.f32 %v819_v28 }
 0x546   : > { %v1670_v29 = vpop.eup %1669 }
 0x547   : > { %v1028_v32 = vmul.f32 %v1670_v29, %v1020_v30 }
 0x568   : > { %v918_v63 = vpop.f32.mrb[16].mxu0 }
 0x569   : > { %v1021_v1 = vadd.f32 %v918_v63, %v804_v51  ;;  %v1532_v2 = vpop.f32.mrb[17].mxu0  ;;  %v1635_v51 = vld [vmem:[%s2112_s9] sm:$0xff]  }
 0x56a   : > { %v921_v4 = vpop.f32.mrb[18].mxu0  ;;  %1555 = vmatpush3.bf16.msra.mxu0 %v1635_v51 }
 0x56b   : > { %v1029_v5 = vmul.f32 %v1662_v3, %v1021_v1  ;;  %v1533_v6 = vpop.f32.mrb[19].mxu0  ;;  %1556 = vmatprep.subr.bf16.mxu0 %v1737_v8  ;;  %v1438_v1 = vld [vmem:[%s2111_s8] ss:$0 sm:$0xff] }
 0x56c   : > { %v966_v7 = vpop.f32.mrb[8].mxu1  ;;  %v1644_v6 = vld [vmem:[%s2114_s11 + $0x38] sm:$0xff]  }
 0x56d   : > { %v1022_v10 = vadd.f32 %v966_v7, %v805_v55  ;;  %v1538_v11 = vpop.f32.mrb[9].mxu1  ;;  %1033 = vrot.lane.b32.xlu1 %v1029_v5, %s1744_s24  ;;  %v1640_v55 = vld [vmem:[%s2114_s11 + $0x18] sm:$0xff]   ;;  %v1643_v5 = vld [vmem:[%s2114_s11 + $0x30] sm:$0xff]   ;;  %v1439_v7 = vld [vmem:[%s2113_s10] ss:$0 sm:$0xff]  ;;  %s1417_s24 = sshll.u32 %s442_s23, 3 }
 0x56e   : > { %v969_v13 = vpop.f32.mrb[10].mxu1  ;;  %s444_s20 = scalar_lea.vmem [#allocation2], %s1417_s24 }
 0x56f   : > { %v1030_v14 = vmul.f32 %v1664_v12, %v1022_v10  ;;  %v1539_v15 = vpop.f32.mrb[11].mxu1  ;;  %s1342_s21 = sshll.u32 %s444_s20, 4  ;;  %s2062_s21 = int_to_ptr.vmem [resolvable:$true] %s1342_s21 }
 0x570   : > { %v1014_v16 = vpop.f32.mrb[20].mxu0  ;;  %s1673_s24 = scalar_lea.vmem %s2062_s21, 128 }
 0x571   : > { %v1023_v17 = vadd.f32 %v1014_v16, %v806_v59  ;;  %1037 = vrot.lane.b32.xlu0 %v1030_v14, %s1745_s30  ;;  %v1544_v18 = vpop.f32.mrb[21].mxu0  ;;  %p1674_p11 = scmp.ne.s32.totalorder %s2062_s21, %s1673_s24  ;;  %s1747_s30 = smov [#allocation2]  }
 0x572   : > { %v1017_v20 = vpop.f32.mrb[22].mxu0 }
 0x573   : > { %v1031_v21 = vmul.f32 %v1666_v19, %v1023_v17  ;;  %v1545_v22 = vpop.f32.mrb[23].mxu0  ;;  %p1675_p12 = pnand %p1674_p11, %p1856_p5 }
 0x575   : > { %1041 = vrot.lane.b32.xlu1 %v1031_v21, %s1746_s15  ;;  %p1676_p13 = pneg %p1675_p12  ;;  %s1677_s15 = sshll.u32 %s1747_s30, 4  ;;  %s1678_s15 = int_to_ptr.vmem [resolvable:$false] %s1677_s15 }
 0x576   : > { %s1679_s2 = scalar_lea.vmem %s1678_s15, 256  ;;  %p1680_p0 = scmp.lt.s32.totalorder %s2062_s21, %s1678_s15 }
 0x577   : > { %p1681_p1 = scmp.lt.s32.totalorder %s1679_s2, %s1673_s24 }
 0x579   : > { %p1682_p2 = por %p1681_p1, %p1680_p0 }
 0x57b   : > { %p1683_p3 = pnand %p1682_p2, %p1676_p13 }
 0x5df   : > { %v1034_v31 = vpop.permute.xlu1 %1033 }
 0x5e0   : > { %v1044_v34 = vsel %vm565_vm2, %v1028_v32, %v1034_v31 }
 0x5e3   : > { %v1038_v33 = vpop.permute.xlu0 %1037 }
 0x5e4   : > { %v1046_v35 = vsel %vm1045_vm4, %v1044_v34, %v1038_v33 }
 0x5e7   : > { %v1042_v36 = vpop.permute.xlu1 %1041 }
 0x5e8   : > { %v1048_v9 = vsel %vm1047_vm5, %v1046_v35, %v1042_v36 }
 0x5e9   : > { %v1049_v37 = vpack.c.bf16 %v1048_v9, %v1048_v9 }
 0x5eb   : > { %1551 = vmatmul.mubr.msk.bf16.vlgmr.msra.gmra.mrb[12].mxu1 %vm459_vm0, %v1049_v37 }
 0x5ec   : > { %1578 = vmatprep.mubr.msk.bf16.mxu1 %vm1738_vm1, %v1737_v8  ;;  %1563 = vmatpush3.bf16.msra.mxu1 %v1637_v52 }
 0x5ed   : > { %1564 = vmatprep.subr.bf16.mxu1 %v1737_v8 }
 0x5f0   : > { %1565 = vmatpush3.bf16.msra.mxu1 %v1638_v53 }
 0x5f1   : > { %1566 = vmatprep.subr.bf16.mxu1 %v1737_v8 }
 0x5f4   : > { %1567 = vmatpush3.bf16.msra.mxu1 %v1639_v54 }
 0x5f5   : > { %1568 = vmatprep.subr.bf16.mxu1 %v1737_v8 }
 0x5f8   : > { %1569 = vmatpush3.bf16.msra.mxu1 %v1640_v55 }
 0x5f9   : > { %1570 = vmatprep.subr.bf16.mxu1 %v1737_v8 }
 0x5fc   : > { %1571 = vmatpush3.bf16.msra.mxu1 %v1641_v56 }
 0x5fd   : > { %1572 = vmatprep.subr.bf16.mxu1 %v1737_v8 }
 0x600   : > { %1573 = vmatpush3.bf16.msra.mxu1 %v1642_v57 }
 0x601   : > { %1574 = vmatprep.subr.bf16.mxu1 %v1737_v8 }
 0x604   : > { %1575 = vmatpush3.bf16.msra.mxu1 %v1643_v5 }
 0x605   : > { %1576 = vmatprep.subr.bf16.mxu1 %v1737_v8  ;;  %v1443_v8 = vld [vmem:[%s2115_s12] ss:$0 sm:$0xff] }
 0x608   : > { %1577 = vmatpush3.bf16.msra.mxu1 %v1644_v6 }
 0x6be   : > { %v1110_v39 = vpop.f32.mrb[12].mxu1 }
 0x6bf   : > { %v1111_v40 = vadd.f32 %v1433_v38, %v1110_v39  ;;  %v1552_v41 = vpop.f32.mrb[13].mxu1 }
 0x6c0   : > { %v1113_v42 = vpop.f32.mrb[14].mxu1 }
 0x6c1   : > { %v1997_v43 = vadd.f32 %v1111_v40, %v1874_v0  ;;  %v1553_v44 = vpop.f32.mrb[15].mxu1  ;;  %v1636_v0 = vld [vmem:[%s2112_s9 + $0x8] sm:$0xff]  }
 0x6c2   : > { %1557 = vmatpush3.bf16.msra.mxu0 %v1636_v0 }
 0x6c3   : > { %v1119_v45 = vsel %vm459_vm0, %v1997_v43, 0.0 }
 0x6c4   : > { %1120 = vadd.xlane.f32.xlu1 %v1119_v45 }
 0x751   : > { %v1121_v46 = vpop.xlane.xlu1 %1120 }
 0x752   : > { %v1122_v47 = vmul.f32 0.03125, %v1121_v46 }
 0x754   : > { %v1123_v48 = vsub.f32 %v1997_v43, %v1122_v47 }
 0x756   : > { %v1124_v49 = vmul.f32 %v1123_v48, %v1123_v48 }
 0x758   : > { %v1125_v50 = vsel %vm459_vm0, %v1124_v49, 0.0 }
 0x759   : > { %1126 = vadd.xlane.f32.xlu0 %v1125_v50 }
 0x7e6   : > { %v1127_v58 = vpop.xlane.xlu0 %1126 }
 0x7e7   : > { %v1128_v59 = vmul.f32 0.03125, %v1127_v58 }
 0x7e9   : > { %v1129_v60 = vadd.f32 1e-05, %v1128_v59 }
 0x7eb   : > { %1671 = vrsqrt.f32 %v1129_v60 }
 0x7f5   : > { %v1672_v61 = vpop.eup %1671 }
 0x7f6   : > { %v1131_v63 = vmul.f32 %v1672_v61, %v1123_v48 }
 0x7f8   : > { %v1138_v2 = vmul.f32 %v1437_v62, %v1131_v63 }
 0x7fa   : > { %v1145_v3 = vadd.f32 %v1438_v1, %v1138_v2 }
 0x7fc   : > { %v1146_v4 = vpack.c.bf16 %v1145_v3, %v1145_v3 }
 0x7fe   : > { %1559 = vmatmul.mubr.msk.bf16.vlgmr.msra.gmra.mrb[24].mxu0 %vm459_vm0, %v1146_v4 }
 0x8d1   : > { %v1207_v10 = vpop.f32.mrb[24].mxu0 }
 0x8d2   : > { %v1208_v11 = vadd.f32 %v1439_v7, %v1207_v10  ;;  %v1560_v12 = vpop.f32.mrb[25].mxu0 }
 0x8d3   : > { %v1210_v13 = vpop.f32.mrb[26].mxu0 }
 0x8d4   : > { %v1213_v14 = vmax.f32 %v1208_v11, 0.0  ;;  %v1561_v15 = vpop.f32.mrb[27].mxu0 }
 0x8d6   : > { %v1214_v16 = vpack.c.bf16 %v1213_v14, %v1213_v14 }
 0x8d8   : > { %1579 = vmatmul.mubr.bf16.vlgmr.msra.gmra.mrb[16].mxu1 %v1214_v16 }
 0x9ab   : > { %v1320_v17 = vpop.f32.mrb[16].mxu1 }
 0x9ac   : > { %v1321_v18 = vadd.f32 %v1443_v8, %v1320_v17  ;;  %v1580_v19 = vpop.f32.mrb[17].mxu1 }
 0x9ad   : > { %v1323_v20 = vpop.f32.mrb[18].mxu1 }
 0x9ae   : > { %v1326_v21 = vadd.f32 %v1321_v18, %v1997_v43  ;;  %v1581_v22 = vpop.f32.mrb[19].mxu1 }
 0x9b0   : > { %1327 = vst.msk [vmem:[%s444_s20] sm:$0xff] %vm459_vm0, %v1326_v21 }
 0x9b1   : > { %1686 = shalt.err (!%p1683_p3)
}
 0x9b2   : > { %s1687_s0 = scalar_lea.hbm %s2060_s1, 128  ;;  %s1691_s20 = scalar_lea.hbm %s2116_s13, 256 }
 0x9b3   : > { %p1688_p4 = scmp.ne.s32.totalorder %s2060_s1, %s1687_s0  ;;  %p1692_p9 = scmp.lt.u32.totalorder %s2060_s1, %s2116_s13 }
 0x9b4   : > { %p1693_p10 = scmp.lt.u32.totalorder %s1691_s20, %s1687_s0  ;;  %p1695_p12 = scmp.lt.u32.totalorder %s1687_s0, %s2060_s1 }
 0x9b5   : > { %p1689_p7 = pnand %p1688_p4, %p1856_p5 }
 0x9b6   : > { %p1694_p11 = por %p1693_p10, %p1692_p9 }
 0x9b7   : > { %p1690_p8 = pneg %p1689_p7 }
 0x9b8   : > { %p1696_p13 = por %p1695_p12, %p1694_p11 }
 0x9ba   : > { %p1697_p0 = pnand %p1696_p13, %p1690_p8 }
 0x9bc   : > { %1700 = shalt.err (!%p1697_p0)
}
 0x9bd   : > { %1582 = dma.vmem_to_hbm [thread:$0]  (%p1856_p5), %s2062_s21, 128, %s2060_s1, %s1329_s29  }
 0x9be PF: > { %p1588_p1 = scmp.ge.s32.totalorder %s1735_s28, 2  ;;  %s1354_s2 = sand.u32 1, %s1723_s25  }
 0x9bf   : > { %s1355_s24 = scalar_lea.sflag [#allocation3], %s1354_s2 }
 0x9c0   : > { %p1585_p2 = pnand %p1588_p1, %p1860_p6 }
 0x9c2   : > { %1718 = dma.done.wait (!%p1585_p2), %s1355_s24, 128  }
 0x9c3   : > { %1720 = vsyncadd (!%p1585_p2), %s1355_s24, 4294967168  ;;  %p23_p3 = scmp.ge.s32.totalorder %s1843_s14, 4   ;;  %s2125_s25 = smov %s1727_s26 }
 0x9c4   : > { %s2126_s26 = smov %s1731_s27  ;;  %s2127_s27 = smov %s1854_s17 }
 0x9c5   : > { %s2128_s28 = smov %s1843_s14  ;;  %25 = sbr.rel (!%p23_p3) target bundleno = 7 (0x7), region = 110 }
 0x9cc   :  { %1360 = vsyncpa [#allocation3], 1 }
 0x9cd   :  { %1362 = vsyncpa [#allocation3 + $0x1], 1 }

</bundles_post_ra>
